<compile_context>
chip_gen: v5e
topology: v5e:2x2
jax: 0.10.0
libtpu: 0.0.40
codegen_flags: <defaults>
</compile_context>

<pallas_src>
import functools
from typing import NamedTuple

import jax
import jax.numpy as jnp
from jax.experimental import pallas as pl
from jax.experimental.pallas import tpu as pltpu

_LANE = 128  # lane alignment (safe on v5e/v6e/v7x; 256 is marginally better on v6e/v7x)


def _round_up(x, m):
    return (x + m - 1) // m * m


def _cdiv(a, b):
    return (a + b - 1) // b


# ----------------------------------------------------------------------------
# Kernel: one (tile_m, E) row tile x one (tile_h) hidden chunk per grid step.
# Grid = (Mp // tile_m, Hp // tile_h); hidden axis is last ("arbitrary").
# ----------------------------------------------------------------------------
def ffn_kernel(x_ref, w1_ref, b1_ref, w2_ref, b2_ref, o_ref, acc_ref,
               *, compute_dtype):
    h_idx = pl.program_id(1)

    @pl.when(h_idx == 0)
    def _init():
        acc_ref[...] = jnp.zeros_like(acc_ref)

    # In-kernel cast of the activation tile (free VPU filler under MXU work).
    x = x_ref[...].astype(compute_dtype)
    h = jnp.dot(x, w1_ref[...], preferred_element_type=jnp.float32)
    h = jnp.maximum(h + b1_ref[...], 0.0)            # bias + ReLU epilogue in f32
    acc_ref[...] += jnp.dot(h.astype(compute_dtype), w2_ref[...],
                            preferred_element_type=jnp.float32)

    @pl.when(h_idx == pl.num_programs(1) - 1)
    def _finalize():
        o_ref[...] = (acc_ref[...] + b2_ref[...]).astype(o_ref.dtype)


# ----------------------------------------------------------------------------
# One-time parameter preparation (cast to compute dtype, lane-dense padding).
# Call once at init; do NOT call per forward step.
# ----------------------------------------------------------------------------
class FFNParams(NamedTuple):
    w1: jax.Array      # (E, Hp)  compute_dtype
    b1: jax.Array      # (1, Hp)  f32
    w2: jax.Array      # (Hp, E)  compute_dtype
    b2: jax.Array      # (1, E)   f32
    n_embd: int
    n_hidden: int
    tile_h: int


def prepare_ffn_params(w1, b1, w2, b2, *, tile_h=512,
                       compute_dtype=jnp.bfloat16, lane_align=_LANE):
    n_embd, n_hidden = w1.shape
    E = _round_up(n_embd, lane_align)
    H0 = _round_up(n_hidden, lane_align)

    # Balance the hidden chunks: n_steps chunks of equal, lane-aligned size.
    n_h_steps = _cdiv(H0, max(_round_up(tile_h, lane_align), lane_align))
    tile_h = _round_up(_cdiv(H0, n_h_steps), lane_align)
    Hp = tile_h * n_h_steps

    cdt = jnp.dtype(compute_dtype)
    w1p = jnp.pad(w1.astype(cdt), ((0, E - n_embd), (0, Hp - n_hidden)))
    w2p = jnp.pad(w2.astype(cdt), ((0, Hp - n_hidden), (0, E - n_embd)))
    b1p = jnp.pad(b1.astype(jnp.float32), (0, Hp - n_hidden)).reshape(1, Hp)
    b2p = jnp.pad(b2.astype(jnp.float32), (0, E - n_embd)).reshape(1, E)
    return FFNParams(w1p, b1p, w2p, b2p, n_embd, n_hidden, tile_h)


# ----------------------------------------------------------------------------
# Forward: x (B, T, n_embd) -> (B, T, n_embd).  Linear -> ReLU -> Linear
# (Dropout is the inference-mode identity).
# ----------------------------------------------------------------------------
def feedforward(x, params: FFNParams, *, tile_m=256, out_dtype=None):
    B, T, n_embd = x.shape
    assert n_embd == params.n_embd, "x feature dim does not match params"
    M = B * T
    E, Hp = params.w1.shape
    tile_h = params.tile_h
    cdt = params.w1.dtype
    out_dtype = x.dtype if out_dtype is None else jnp.dtype(out_dtype)

    # Row tiling: multiple of 16 (bf16 sublane packing), clamped to problem.
    # (v6e with >=100 MiB VMEM can profitably use tile_m=512.)
    tile_m = max(16, min(_round_up(tile_m, 16), _round_up(M, 16)))
    Mp = _round_up(M, tile_m)

    x2 = x.reshape(M, n_embd)
    if (Mp, E) != (M, n_embd):   # skip the pad pass entirely when aligned
        x2 = jnp.pad(x2, ((0, Mp - M), (0, E - n_embd)))

    x_it = jnp.dtype(x2.dtype).itemsize
    c_it = jnp.dtype(cdt).itemsize
    o_it = jnp.dtype(out_dtype).itemsize
    n_m = Mp // tile_m
    n_h = Hp // tile_h

    # Advisory cost estimate (weights re-stream once per row tile).
    cost = pl.CostEstimate(
        flops=4 * Mp * E * Hp,
        transcendentals=0,
        bytes_accessed=(Mp * E * x_it + Mp * E * o_it
                        + n_m * (2 * E * Hp * c_it + Hp * 4) + E * 4),
    )

    # VMEM budget: double-buffered streaming blocks + f32 accumulator + the
    # in-kernel f32/bf16 temporaries.  Cap at 85% of the device's physical
    # VMEM (v7x: 64 MiB, v5e/v6e: 128 MiB).
    vmem_need = (
        2 * tile_m * E * x_it              # x tiles
        + 2 * tile_m * E * o_it            # out tiles
        + 2 * E * tile_h * c_it            # W1 blocks
        + 2 * tile_h * E * c_it            # W2 blocks
        + 2 * tile_h * 4 + 2 * E * 4       # biases
        + tile_m * E * 4                   # f32 accumulator scratch
        + tile_m * tile_h * (4 + c_it)     # f32 h + compute-dtype copy of h
        + tile_m * E * c_it                # in-kernel cast of x tile
    )
    try:
        vmem_cap = int(0.85 * pltpu.get_tpu_info().vmem_capacity_bytes)
    except Exception:
        vmem_cap = 48 * 2**20              # safe cap for v7x (64 MiB physical)
    vmem_limit = int(min(vmem_cap, max(32 * 2**20, 2 * vmem_need)))

    kernel = functools.partial(ffn_kernel, compute_dtype=cdt)

    out2 = pl.pallas_call(
        kernel,
        out_shape=jax.ShapeDtypeStruct((Mp, E), out_dtype),
        grid_spec=pltpu.PrefetchScalarGridSpec(
            num_scalar_prefetch=0,
            grid=(n_m, n_h),
            in_specs=[
                pl.BlockSpec((tile_m, E), lambda i, h: (i, 0)),   # x tile
                pl.BlockSpec((E, tile_h), lambda i, h: (0, h)),   # W1 chunk
                pl.BlockSpec((1, tile_h), lambda i, h: (0, h)),   # b1 chunk
                pl.BlockSpec((tile_h, E), lambda i, h: (h, 0)),   # W2 chunk
                pl.BlockSpec((1, E), lambda i, h: (0, 0)),        # b2 (resident)
            ],
            out_specs=pl.BlockSpec((tile_m, E), lambda i, h: (i, 0)),
            scratch_shapes=[pltpu.VMEM((tile_m, E), jnp.float32)],
        ),
        compiler_params=pltpu.CompilerParams(
            dimension_semantics=("parallel", "arbitrary"),
            vmem_limit_bytes=vmem_limit,
        ),
        cost_estimate=cost,
    )(x2, params.w1, params.b1, params.w2, params.b2)

    return out2[:M, :n_embd].reshape(B, T, n_embd)


def reference_ffn(x, w1, b1, w2, b2):
    h = jnp.maximum(x @ w1 + b1, 0.0)
    return h @ w2 + b2


if __name__ == "__main__":
    # Small shapes consistent with the module: n_embd=32, n_hidden=4*n_embd=128.
    B, T, n_embd, n_hidden = 2, 8, 32, 128

    key = jax.random.PRNGKey(0)
    kx, k1, k2, k3, k4 = jax.random.split(key, 5)

    x = jax.random.normal(kx, (B, T, n_embd), dtype=jnp.float32)
    # Deterministic parameter init (uniform, roughly matching nn.Linear scale).
    w1 = jax.random.uniform(k1, (n_embd, n_hidden), jnp.float32,
                            minval=-1.0, maxval=1.0) / jnp.sqrt(n_embd)
    b1 = jax.random.uniform(k2, (n_hidden,), jnp.float32,
                            minval=-1.0, maxval=1.0) / jnp.sqrt(n_embd)
    w2 = jax.random.uniform(k3, (n_hidden, n_embd), jnp.float32,
                            minval=-1.0, maxval=1.0) / jnp.sqrt(n_hidden)
    b2 = jax.random.uniform(k4, (n_embd,), jnp.float32,
                            minval=-1.0, maxval=1.0) / jnp.sqrt(n_hidden)

    # One-time parameter prep (cast/pad), then the kernel call.
    params = prepare_ffn_params(w1, b1, w2, b2)
    out = feedforward(x, params)
    out = jax.block_until_ready(out)

    ref = reference_ffn(x, w1, b1, w2, b2)
    assert out.shape == (B, T, n_embd)
    # bf16 MXU operands with f32 accumulation -> loosened tolerance vs f32 ref.
    assert jnp.allclose(out, ref, atol=2e-2, rtol=2e-2), "mismatch vs reference"

    print("KERNEL_OK")
</pallas_src>

<mosaic_0001>
module attributes {stable_mosaic.version = 11 : i64} {
  func.func @ffn_kernel(%arg0: i32, %arg1: i32, %arg2: memref<16x128xf32, #tpu.memory_space<vmem>>, %arg3: memref<128x128xbf16, #tpu.memory_space<vmem>>, %arg4: memref<1x128xf32, #tpu.memory_space<vmem>>, %arg5: memref<128x128xbf16, #tpu.memory_space<vmem>>, %arg6: memref<1x128xf32, #tpu.memory_space<vmem>>, %arg7: memref<16x128xf32, #tpu.memory_space<vmem>>, %arg8: memref<16x128xf32, #tpu.memory_space<vmem>>) attributes {dimension_semantics = [#tpu.dimension_semantics<parallel>, #tpu.dimension_semantics<arbitrary>], iteration_bounds = array<i64: 1, 1>, scalar_prefetch = 0 : i64, scratch_operands = 1 : i64, tpu.core_type = #tpu.core_type<tc>, window_params = [{transform_indices = @transform_0, window_bounds = array<i64: 16, 128>}, {transform_indices = @transform_1, window_bounds = array<i64: 128, 128>}, {transform_indices = @transform_2, window_bounds = array<i64: 1, 128>}, {transform_indices = @transform_3, window_bounds = array<i64: 128, 128>}, {pipeline_mode = #tpu.pipeline_mode<synchronous>, transform_indices = @transform_4, window_bounds = array<i64: 1, 128>}, {transform_indices = @transform_5, window_bounds = array<i64: 16, 128>}]} {
    %c0_i32 = arith.constant 0 : i32
    %0 = arith.cmpi eq, %arg1, %c0_i32 : i32
    %1 = arith.extui %0 : i1 to i32
    %c0_i32_0 = arith.constant 0 : i32
    %2 = arith.cmpi ne, %1, %c0_i32_0 : i32
    scf.if %2 {
      %cst_16 = arith.constant 0.000000e+00 : f32
      %21 = vector.broadcast %cst_16 : f32 to vector<16x128xf32>
      %c0_17 = arith.constant 0 : index
      %c0_18 = arith.constant 0 : index
      %22 = vector.load %arg8[%c0_17, %c0_18] : memref<16x128xf32, #tpu.memory_space<vmem>>, vector<16x128xf32>
      tpu.vector_store %arg8[%c0_17, %c0_18], %21 {strides = array<i32>} : memref<16x128xf32, #tpu.memory_space<vmem>>, vector<16x128xf32>,
    } else {
    }
    %c0 = arith.constant 0 : index
    %c0_1 = arith.constant 0 : index
    %3 = vector.load %arg2[%c0, %c0_1] : memref<16x128xf32, #tpu.memory_space<vmem>>, vector<16x128xf32>
    %4 = arith.truncf %3 : vector<16x128xf32> to vector<16x128xbf16>
    %c0_2 = arith.constant 0 : index
    %c0_3 = arith.constant 0 : index
    %5 = vector.load %arg3[%c0_2, %c0_3] : memref<128x128xbf16, #tpu.memory_space<vmem>>, vector<128x128xbf16>
    %cst = arith.constant dense<0.000000e+00> : vector<16x128xf32>
    %6 = tpu.matmul %4, %5, %cst {dimension_numbers = #tpu.dot_dimension_numbers<[1], [0], [0], [1], [0, 0, 1, 1], [], []>} : vector<16x128xbf16>, vector<128x128xbf16>, vector<16x128xf32> -> vector<16x128xf32>
    %c0_4 = arith.constant 0 : index
    %c0_5 = arith.constant 0 : index
    %7 = vector.load %arg4[%c0_4, %c0_5] : memref<1x128xf32, #tpu.memory_space<vmem>>, vector<1x128xf32>
    %8 = vector.broadcast %7 : vector<1x128xf32> to vector<16x128xf32>
    %9 = arith.addf %6, %8 : vector<16x128xf32>
    %cst_6 = arith.constant 0.000000e+00 : f32
    %10 = vector.broadcast %cst_6 : f32 to vector<16x128xf32>
    %11 = arith.maximumf %9, %10 : vector<16x128xf32>
    %c0_7 = arith.constant 0 : index
    %c0_8 = arith.constant 0 : index
    %12 = vector.load %arg8[%c0_7, %c0_8] : memref<16x128xf32, #tpu.memory_space<vmem>>, vector<16x128xf32>
    %13 = arith.truncf %11 : vector<16x128xf32> to vector<16x128xbf16>
    %c0_9 = arith.constant 0 : index
    %c0_10 = arith.constant 0 : index
    %14 = vector.load %arg5[%c0_9, %c0_10] : memref<128x128xbf16, #tpu.memory_space<vmem>>, vector<128x128xbf16>
    %cst_11 = arith.constant dense<0.000000e+00> : vector<16x128xf32>
    %15 = tpu.matmul %13, %14, %cst_11 {dimension_numbers = #tpu.dot_dimension_numbers<[1], [0], [0], [1], [0, 0, 1, 1], [], []>} : vector<16x128xbf16>, vector<128x128xbf16>, vector<16x128xf32> -> vector<16x128xf32>
    %16 = arith.addf %12, %15 : vector<16x128xf32>
    %c0_12 = arith.constant 0 : index
    %c0_13 = arith.constant 0 : index
    %17 = vector.load %arg8[%c0_12, %c0_13] : memref<16x128xf32, #tpu.memory_space<vmem>>, vector<16x128xf32>
    tpu.vector_store %arg8[%c0_12, %c0_13], %16 {strides = array<i32>} : memref<16x128xf32, #tpu.memory_space<vmem>>, vector<16x128xf32>,
    %c0_i32_14 = arith.constant 0 : i32
    %18 = arith.cmpi eq, %arg1, %c0_i32_14 : i32
    %19 = arith.extui %18 : i1 to i32
    %c0_i32_15 = arith.constant 0 : i32
    %20 = arith.cmpi ne, %19, %c0_i32_15 : i32
    scf.if %20 {
      %c0_16 = arith.constant 0 : index
      %c0_17 = arith.constant 0 : index
      %21 = vector.load %arg8[%c0_16, %c0_17] : memref<16x128xf32, #tpu.memory_space<vmem>>, vector<16x128xf32>
      %c0_18 = arith.constant 0 : index
      %c0_19 = arith.constant 0 : index
      %22 = vector.load %arg6[%c0_18, %c0_19] : memref<1x128xf32, #tpu.memory_space<vmem>>, vector<1x128xf32>
      %23 = vector.broadcast %22 : vector<1x128xf32> to vector<16x128xf32>
      %24 = arith.addf %21, %23 : vector<16x128xf32>
      %c0_20 = arith.constant 0 : index
      %c0_21 = arith.constant 0 : index
      %25 = vector.load %arg7[%c0_20, %c0_21] : memref<16x128xf32, #tpu.memory_space<vmem>>, vector<16x128xf32>
      tpu.vector_store %arg7[%c0_20, %c0_21], %24 {strides = array<i32>} : memref<16x128xf32, #tpu.memory_space<vmem>>, vector<16x128xf32>,
    } else {
    }
    return
  }
  func.func @transform_0(%arg0: i32, %arg1: i32) -> (i32, i32) {
    %c0_i32 = arith.constant 0 : i32
    %c0_i32_0 = arith.constant 0 : i32
    return %arg0, %c0_i32 : i32, i32
  }
  func.func @transform_1(%arg0: i32, %arg1: i32) -> (i32, i32) {
    %c0_i32 = arith.constant 0 : i32
    %c0_i32_0 = arith.constant 0 : i32
    return %c0_i32, %arg1 : i32, i32
  }
  func.func @transform_2(%arg0: i32, %arg1: i32) -> (i32, i32) {
    %c0_i32 = arith.constant 0 : i32
    %c0_i32_0 = arith.constant 0 : i32
    return %c0_i32, %arg1 : i32, i32
  }
  func.func @transform_3(%arg0: i32, %arg1: i32) -> (i32, i32) {
    %c0_i32 = arith.constant 0 : i32
    %c0_i32_0 = arith.constant 0 : i32
    return %arg1, %c0_i32 : i32, i32
  }
  func.func @transform_4(%arg0: i32, %arg1: i32) -> (i32, i32) {
    %c0_i32 = arith.constant 0 : i32
    %c0_i32_0 = arith.constant 0 : i32
    %c0_i32_1 = arith.constant 0 : i32
    return %c0_i32, %c0_i32_0 : i32, i32
  }
  func.func @transform_5(%arg0: i32, %arg1: i32) -> (i32, i32) {
    %c0_i32 = arith.constant 0 : i32
    %c0_i32_0 = arith.constant 0 : i32
    return %arg0, %c0_i32 : i32, i32
  }
}

</mosaic_0001>

<bundles_post_ra>
// kernel: tpu_custom_call.1
= control target key start
LH: loop header
LB: loop body
LE: loop exit
PB: predicated region body
PF: predicated region fallthrough
CT: control target
= control target key end

     0   :  { %10 = vsyncpa [#allocation4], 0  ;;  %s533_s0 = inlined_call_operand.hbm [shape: f32[16,128], index: 0, kind: input, shape index: {}]   ;;  %s534_s1 = inlined_call_operand.hbm [shape: bf16[128,128], index: 1, kind: input, shape index: {}]   ;;  %s535_s2 = inlined_call_operand.vmem [shape: f32[1,128], index: 2, kind: input, shape index: {}]   ;;  %s536_s3 = inlined_call_operand.hbm [shape: bf16[128,128], index: 3, kind: input, shape index: {}]   ;;  %s537_s4 = inlined_call_operand.vmem [shape: f32[1,128], index: 4, kind: input, shape index: {}]   ;;  %s538_s5 = inlined_call_operand.hbm [shape: f32[16,128], index: 5, kind: output, shape index: {}]  }
   0x1   :  { %11 = vsyncpa [#allocation7], 0  ;;  %s30_s20 = sshll.u32 %s534_s1, 4  ;;  %s31_s20 = int_to_ptr.hbm [resolvable:$true] %s30_s20 }
   0x2   :  { %12 = vsyncpa [#allocation5], 0  ;;  %s471_s21 = smov [#allocation6]   ;;  %s17_s25 = sshll.u32 %s533_s0, 4  ;;  %s18_s25 = int_to_ptr.hbm [resolvable:$true] %s17_s25 }
   0x3   :  { %s32_s22 = sshll.u32 %s471_s21, 4  ;;  %s472_s26 = smov 64   ;;  %s33_s22 = int_to_ptr.vmem [resolvable:$true] %s32_s22 }
   0x4   :  { %s473_s27 = smov 4   ;;  %s474_s28 = smov [#allocation3]  }
   0x5   :  { %38 = dma.hbm_to_vmem [thread:$0]  %s31_s20, 1024, %s33_s22, [#allocation7], %s472_s26, %s472_s26, %s473_s27  }
   0x6   :  { %s19_s29 = sshll.u32 %s474_s28, 4  ;;  %s475_s30 = smov 128   ;;  %s20_s29 = int_to_ptr.vmem [resolvable:$true] %s19_s29 }
   0x7   :  { %s476_s6 = smov 8   ;;  %s45_s8 = sshll.u32 %s536_s3, 4  ;;  %s46_s8 = int_to_ptr.hbm [resolvable:$true] %s45_s8 }
   0x8   :  { %25 = dma.hbm_to_vmem [thread:$0]  %s18_s25, 256, %s20_s29, [#allocation4], %s475_s30, %s475_s30, %s476_s6  }
   0x9   :  { %s477_s9 = smov [#allocation8]  }
   0xa   :  { %s47_s0 = sshll.u32 %s477_s9, 4  ;;  %s48_s0 = int_to_ptr.vmem [resolvable:$true] %s47_s0 }
   0xb   :  { %53 = dma.hbm_to_vmem [thread:$0]  %s46_s8, 1024, %s48_s0, [#allocation7], %s472_s26, %s472_s26, %s473_s27  }
   0xc   :  { %465 = dma.done.wait [#allocation4], 256  }
   0xd   :  { %466 = vsyncadd [#allocation4], 4294967040 }
   0xe   :  { %467 = dma.done.wait [#allocation7], 2048  }
   0xf   :  { %468 = vsyncadd [#allocation7], 4294965248  ;;  %v350_v0 = vld [vmem:[#allocation6 + $0x38] sm:$0xff]  ;;  %v349_v1 = vld [vmem:[#allocation6 + $0x30] sm:$0xff]  ;;  %s478_s13 = smov [#allocation9]  }
  0x10   :  { %145 = vmatpush.bf16.msra.mxu0 %v350_v0  ;;  %v358_v2 = vld [vmem:[#allocation8 + $0x38] sm:$0xff]  ;;  %v357_v3 = vld [vmem:[#allocation8 + $0x30] sm:$0xff]  ;;  %v348_v4 = vld [vmem:[#allocation6 + $0x28] sm:$0xff]  ;;  %s263_s14 = sshll.u32 %s478_s13, 4  ;;  %s264_s14 = int_to_ptr.vmem [resolvable:$true] %s263_s14 }
  0x11   :  { %228 = vmatpush.bf16.msra.mxu1 %v358_v2  ;;  %v356_v5 = vld [vmem:[#allocation8 + $0x28] sm:$0xff]  ;;  %v347_v6 = vld [vmem:[#allocation6 + $0x20] sm:$0xff]  ;;  %v346_v8 = vld [vmem:[#allocation6 + $0x18] sm:$0xff] }
  0x12   :  { %v355_v7 = vld [vmem:[#allocation8 + $0x20] sm:$0xff]  ;;  %v345_v9 = vld [vmem:[#allocation6 + $0x10] sm:$0xff]  ;;  %v344_v10 = vld [vmem:[#allocation6 + $0x8] sm:$0xff] }
  0x13   :  { %v343_v11 = vld [vmem:[#allocation6] sm:$0xff]  ;;  %v74_v12 = vld [vmem:[#allocation3] sm:$0xff]  ;;  %v75_v13 = vld [vmem:[#allocation3 + $0x8] sm:$0xff] }
  0x14   :  { %146 = vmatpush.bf16.msra.mxu0 %v349_v1  ;;  %v76_v14 = vpack.c.bf16 %v75_v13, %v74_v12  ;;  %v354_v15 = vld [vmem:[#allocation8 + $0x18] sm:$0xff]  ;;  %v353_v16 = vld [vmem:[#allocation8 + $0x10] sm:$0xff]  ;;  %v352_v17 = vld [vmem:[#allocation8 + $0x8] sm:$0xff] }
  0x15   :  { %229 = vmatpush.bf16.msra.mxu1 %v357_v3  ;;  %v351_v18 = vld [vmem:[#allocation8] sm:$0xff]  ;;  %v367_v20 = vld [vmem:[%s535_s2] ss:$0 sm:$0xff]  ;;  %s265_s2 = sshll.u32 %s538_s5, 4  ;;  %s266_s2 = int_to_ptr.hbm [resolvable:$true] %s265_s2 }
  0x16   :  { %v368_v27 = vld [vmem:[%s537_s4] ss:$0 sm:$0xff] }
  0x18   :  { %147 = vmatpush.bf16.msra.mxu0 %v348_v4 }
  0x19   :  { %230 = vmatpush.bf16.msra.mxu1 %v356_v5 }
  0x1c   :  { %148 = vmatpush.bf16.msra.mxu0 %v347_v6 }
  0x1d   :  { %231 = vmatpush.bf16.msra.mxu1 %v355_v7 }
  0x20   :  { %149 = vmatpush.bf16.msra.mxu0 %v346_v8 }
  0x21   :  { %232 = vmatpush.bf16.msra.mxu1 %v354_v15 }
  0x24   :  { %150 = vmatpush.bf16.msra.mxu0 %v345_v9 }
  0x25   :  { %233 = vmatpush.bf16.msra.mxu1 %v353_v16 }
  0x28   :  { %151 = vmatpush.bf16.msra.mxu0 %v344_v10 }
  0x29   :  { %234 = vmatpush.bf16.msra.mxu1 %v352_v17 }
  0x2c   :  { %152 = vmatpush.bf16.msra.mxu0 %v343_v11 }
  0x2d   :  { %235 = vmatpush.bf16.msra.mxu1 %v351_v18 }
  0x2f   :  { %153 = vmatmul.bf16.vlgmr.msra.gmra.mxu0 %v76_v14 }
  0xac   :  { %v154_v19 = vpop.f32.mrf.mxu0 }
  0xad   :  { %v155_v21 = vadd.f32 %v367_v20, %v154_v19 }
  0xaf   :  { %v159_v24 = vmax.f32 %v155_v21, 0.0 }
  0xb4   :  { %v156_v22 = vpop.f32.mrf.mxu0 }
  0xb5   :  { %v157_v23 = vadd.f32 %v367_v20, %v156_v22 }
  0xb7   :  { %v160_v25 = vmax.f32 %v157_v23, 0.0 }
  0xb9   :  { %v163_v26 = vpack.c.bf16 %v160_v25, %v159_v24 }
  0xbb   :  { %236 = vmatmul.bf16.vlgmr.msra.gmra.mxu1 %v163_v26 }
 0x138   :  { %v237_v28 = vpop.f32.mrf.mxu1 }
 0x139   :  { %v255_v29 = vadd.f32 %v368_v27, %v237_v28 }
 0x13b   :  { %257 = vst [vmem:[#allocation9] sm:$0xff] %v255_v29 }
 0x140   :  { %v239_v30 = vpop.f32.mrf.mxu1 }
 0x141   :  { %v256_v31 = vadd.f32 %v368_v27, %v239_v30 }
 0x143   :  { %258 = vst [vmem:[#allocation9 + $0x8] sm:$0xff] %v256_v31 }
 0x144   :  { %271 = dma.vmem_to_hbm [thread:$0]  %s264_s14, 256, %s266_s2, [#allocation5], %s475_s30, %s475_s30, %s476_s6  }
 0x145   :  { %469 = dma.done.wait [#allocation5], 256  }
 0x146   :  { %470 = vsyncadd [#allocation5], 4294967040 }
 0x147   :  { %276 = vsyncpa [#allocation4], 1 }
 0x148   :  { %277 = vsyncpa [#allocation7], 1 }
 0x149   :  { %278 = vsyncpa [#allocation5], 1 }

</bundles_post_ra>
